<compile_context>
chip_gen: v6e
topology: v6e:2x2x1
jax: 0.10.0
libtpu: 0.0.40
codegen_flags: <defaults>
</compile_context>

<pallas_src>
import jax
import jax.numpy as jnp
from jax import lax
from jax.experimental import pallas as pl
from jax.experimental.pallas import tpu as pltpu


# ---------------------------------------------------------------------------
# Pallas kernel: one batch element (and one row tile of atoms i) per grid step.
#   a_ref : [T, tn, K]   rows are [psi_r | psi_i] for atom i           (K = 2*(2l+1))
#   q_ref : [T, 2N, K]   rows j<N: [q_r | -q_i] (real part operand)
#                        rows j>=N: [q_i |  q_r] (imag part operand)
#   o_ref : [T, tn, 2N]  columns j<N: Re(psi_i . psi~_j), j>=N: Im(psi_i . psi~_j)
# One batched (over T) matmul, contracting K, accumulated in f32 on the MXU.
# ---------------------------------------------------------------------------
def _dot_kernel(a_ref, q_ref, o_ref):
    a = a_ref[...]
    q = q_ref[...]
    out = lax.dot_general(
        a, q,
        dimension_numbers=(((2,), (2,)), ((0,), (0,))),   # contract K, batch over T
        preferred_element_type=jnp.float32)               # [T, tn, 2N]
    o_ref[...] = out.astype(o_ref.dtype)


def _pick_row_tile(n):
    """Largest power-of-two row tile (<=256, multiple of 8) dividing n; else full n."""
    if n <= 256 or n % 8 != 0:
        return n
    tile, t = 8, 8
    while t <= 256:
        if n % t == 0:
            tile = t
        t *= 2
    return tile


def _pairwise_dot(A, Q):
    """A: [B, T, N, K], Q: [B, T, 2N, K] -> out [B, T, N, 2N] (real cols | imag cols)."""
    B, T, N, K = A.shape
    tn = _pick_row_tile(N)
    grid = (B, N // tn)
    return pl.pallas_call(
        _dot_kernel,
        out_shape=jax.ShapeDtypeStruct((B, T, N, 2 * N), A.dtype),
        grid=grid,
        in_specs=[
            pl.BlockSpec((None, T, tn, K), lambda b, i: (b, 0, i, 0)),
            pl.BlockSpec((None, T, 2 * N, K), lambda b, i: (b, 0, 0, 0)),
        ],
        out_specs=pl.BlockSpec((None, T, tn, 2 * N), lambda b, i: (b, 0, i, 0)),
        compiler_params=pltpu.CompilerParams(
            dimension_semantics=("parallel", "parallel")),
    )(A, Q)


def _signs(ell, dtype):
    # (-1)^m for m in [-ell, ..., ell] (exact, avoiding float pow of a negative base).
    m = jnp.arange(2 * ell + 1) - ell
    return jnp.where(m % 2 == 0, jnp.asarray(1.0, dtype), jnp.asarray(-1.0, dtype))


def dot_matrix(reps, cat=True):
    """JAX/Pallas equivalent of DotMatrix.forward.

    reps: list of arrays, reps[ell] has shape [B, N, tau_ell, 2*ell+1, 2].
    Returns a list of arrays [B, N, N, C, 2] (C = sum(tau) if cat else tau_ell).
    """
    outs = []
    for ell, psi in enumerate(reps):
        B, N, T, M, _ = psi.shape
        sign = _signs(ell, psi.dtype)                       # [M]
        q = jnp.flip(psi, axis=-2) * sign[:, None]          # flipped + signed copy
        a_r, a_i = psi[..., 0], psi[..., 1]                 # [B, N, T, M]
        q_r, q_i = q[..., 0], q[..., 1]

        # LHS rows (per b, t, atom i):  [a_r | a_i]                       -> [B, T, N, 2M]
        A = jnp.concatenate([a_r, a_i], axis=-1).transpose(0, 2, 1, 3)
        # Merged RHS rows (per b, t): first N rows give Re, next N give Im -> [B, T, 2N, 2M]
        Q = jnp.concatenate(
            [jnp.concatenate([q_r, -q_i], axis=-1),
             jnp.concatenate([q_i, q_r], axis=-1)],
            axis=1).transpose(0, 2, 1, 3)

        out = _pairwise_dot(A, Q)                           # [B, T, N, 2N] in psi.dtype
        out_r, out_i = out[..., :N], out[..., N:]
        res = jnp.stack([out_r, out_i], axis=-1)            # [B, T, i, j, 2]
        outs.append(res.transpose(0, 2, 3, 1, 4))           # [B, i, j, T, 2]

    if cat:
        catted = jnp.concatenate(outs, axis=-2)             # [B, i, j, sum(tau), 2]
        return [catted] * len(reps)
    return outs


# ---------------------------------------------------------------------------
# Pure-JAX reference that mirrors the PyTorch forward exactly (for verification).
# ---------------------------------------------------------------------------
def dot_matrix_reference(reps, cat=True):
    dtype = reps[0].dtype
    signs = [_signs(ell, dtype)[:, None] for ell in range(len(reps))]
    conj = jnp.array([1.0, -1.0], dtype=dtype)
    reps1 = [jnp.expand_dims(p, -4) for p in reps]
    reps2 = [jnp.flip(jnp.expand_dims(p, -5), axis=-2) * s for p, s in zip(reps, signs)]
    dot_r = [(p1 * p2 * conj).sum(axis=(-2, -1)) for p1, p2 in zip(reps1, reps2)]
    dot_i = [(p1 * jnp.flip(p2, axis=-1)).sum(axis=(-2, -1)) for p1, p2 in zip(reps1, reps2)]
    dots = [jnp.stack([r, i], axis=-1) for r, i in zip(dot_r, dot_i)]
    if cat:
        catted = jnp.concatenate(dots, axis=-2)
        return [catted] * len(reps)
    return dots


if __name__ == "__main__":
    # Small, deterministic example: batch=2, atoms=8, tau_in=(4, 4) i.e. ell in {0, 1}.
    # DotMatrix has no learned parameters; sign/conj constants are built in-script.
    B, N = 2, 8
    tau_in = (4, 4)
    key = jax.random.PRNGKey(0)
    reps = []
    for ell, t in enumerate(tau_in):
        key, sub = jax.random.split(key)
        reps.append(jax.random.normal(sub, (B, N, t, 2 * ell + 1, 2), dtype=jnp.float32))

    out = dot_matrix(reps, cat=True)
    out = [jax.block_until_ready(o) for o in out]

    ref = dot_matrix_reference(reps, cat=True)
    for o, r in zip(out, ref):
        assert o.shape == r.shape, (o.shape, r.shape)
        assert jnp.allclose(o, r, atol=1e-5, rtol=1e-5), "mismatch vs reference"

    print("KERNEL_OK")
</pallas_src>

<mosaic_0001>
module attributes {stable_mosaic.version = 11 : i64} {
  func.func @_dot_kernel(%arg0: i32, %arg1: i32, %arg2: memref<1x4x8x2xf32, #tpu.memory_space<vmem>>, %arg3: memref<1x4x16x2xf32, #tpu.memory_space<vmem>>, %arg4: memref<1x4x8x16xf32, #tpu.memory_space<vmem>>) attributes {dimension_semantics = [#tpu.dimension_semantics<parallel>, #tpu.dimension_semantics<parallel>], iteration_bounds = array<i64: 2, 1>, scalar_prefetch = 0 : i64, scratch_operands = 0 : i64, tpu.core_type = #tpu.core_type<tc>, window_params = [{transform_indices = @transform_0, window_bounds = array<i64: 1, 4, 8, 2>}, {transform_indices = @transform_1, window_bounds = array<i64: 1, 4, 16, 2>}, {transform_indices = @transform_2, window_bounds = array<i64: 1, 4, 8, 16>}]} {
    %c0 = arith.constant 0 : index
    %c0_0 = arith.constant 0 : index
    %c0_1 = arith.constant 0 : index
    %c0_2 = arith.constant 0 : index
    %0 = vector.load %arg2[%c0, %c0_0, %c0_1, %c0_2] : memref<1x4x8x2xf32, #tpu.memory_space<vmem>>, vector<1x4x8x2xf32>
    %1 = vector.shape_cast %0 : vector<1x4x8x2xf32> to vector<4x8x2xf32>
    %c0_3 = arith.constant 0 : index
    %c0_4 = arith.constant 0 : index
    %c0_5 = arith.constant 0 : index
    %c0_6 = arith.constant 0 : index
    %2 = vector.load %arg3[%c0_3, %c0_4, %c0_5, %c0_6] : memref<1x4x16x2xf32, #tpu.memory_space<vmem>>, vector<1x4x16x2xf32>
    %3 = vector.shape_cast %2 : vector<1x4x16x2xf32> to vector<4x16x2xf32>
    %cst = arith.constant dense<0.000000e+00> : vector<4x8x16xf32>
    %4 = tpu.matmul %1, %3, %cst {dimension_numbers = #tpu.dot_dimension_numbers<[2], [2], [1], [1], [0, 0, 0, 1, 1, 1], [0], [0]>} : vector<4x8x2xf32>, vector<4x16x2xf32>, vector<4x8x16xf32> -> vector<4x8x16xf32>
    %c0_7 = arith.constant 0 : index
    %c0_8 = arith.constant 0 : index
    %c0_9 = arith.constant 0 : index
    %c0_10 = arith.constant 0 : index
    %5 = vector.load %arg4[%c0_7, %c0_8, %c0_9, %c0_10] : memref<1x4x8x16xf32, #tpu.memory_space<vmem>>, vector<1x4x8x16xf32>
    %6 = vector.shape_cast %5 : vector<1x4x8x16xf32> to vector<4x8x16xf32>
    %7 = vector.shape_cast %4 : vector<4x8x16xf32> to vector<1x4x8x16xf32>
    tpu.vector_store %arg4[%c0_7, %c0_8, %c0_9, %c0_10], %7 {strides = array<i32>} : memref<1x4x8x16xf32, #tpu.memory_space<vmem>>, vector<1x4x8x16xf32>,
    return
  }
  func.func @transform_0(%arg0: i32, %arg1: i32) -> (i32, i32, i32, i32) {
    %c0_i32 = arith.constant 0 : i32
    %c0_i32_0 = arith.constant 0 : i32
    %c0_i32_1 = arith.constant 0 : i32
    return %arg0, %c0_i32, %arg1, %c0_i32_0 : i32, i32, i32, i32
  }
  func.func @transform_1(%arg0: i32, %arg1: i32) -> (i32, i32, i32, i32) {
    %c0_i32 = arith.constant 0 : i32
    %c0_i32_0 = arith.constant 0 : i32
    %c0_i32_1 = arith.constant 0 : i32
    %c0_i32_2 = arith.constant 0 : i32
    return %arg0, %c0_i32, %c0_i32_0, %c0_i32_1 : i32, i32, i32, i32
  }
  func.func @transform_2(%arg0: i32, %arg1: i32) -> (i32, i32, i32, i32) {
    %c0_i32 = arith.constant 0 : i32
    %c0_i32_0 = arith.constant 0 : i32
    %c0_i32_1 = arith.constant 0 : i32
    return %arg0, %c0_i32, %arg1, %c0_i32_0 : i32, i32, i32, i32
  }
}

</mosaic_0001>

<bundles_post_ra>
// kernel: tpu_custom_call.1
= control target key start
LH: loop header
LB: loop body
LE: loop exit
PB: predicated region body
PF: predicated region fallthrough
CT: control target
= control target key end

     0   :  { %7 = vsyncpa [#allocation3], 0  ;;  %s986_s0 = inlined_call_operand.vmem [shape: f32[2,4,8,2], index: 0, kind: input, shape index: {}]   ;;  %s987_s1 = inlined_call_operand.vmem [shape: f32[2,4,16,2], index: 1, kind: input, shape index: {}]   ;;  %s988_s2 = inlined_call_operand.hbm [shape: f32[2,4,8,16], index: 2, kind: output, shape index: {}]  }
   0x1   :  { %9 = vsyncpa [#allocation3 + $0x1], 0  ;;  %s853_s9 = smov 0   ;;  %s855_s10 = smov 0  }
   0x2   :  { %s857_s11 = smov 0   ;;  %s859_s12 = smov 0  }
   0x3   :  { %s861_s13 = smov 0   ;;  %s863_s14 = smov 0  }
   0x4 LB: > { %s626_s15 = sadd.s32 4294967295, %s831_s14   ;;  %s627_s16 = sadd.s32 4294967294, %s831_s14   ;;  %s831_s14 = sphi %s863_s14, %s15_s14   ;;  %s827_s13 = sphi %s861_s13, %s995_s13   ;;  %s823_s12 = sphi %s859_s12, %s994_s12   ;;  %s819_s11 = sphi %s857_s11, %s993_s11   ;;  %s815_s10 = sphi %s855_s10, %s992_s10   ;;  %s811_s9 = sphi %s853_s9, %s991_s9  }
   0x5   : > { %s27_s17 = sadd.s32 1, %s827_s13  ;;  %s90_s18 = sadd.s32 1, %s819_s11 }
   0x6   : > { %p29_p0 = scmp.ge.s32.totalorder %s27_s17, 2  ;;  %p100_p1 = scmp.ne.s32.totalorder %s819_s11, %s815_s10 }
   0x7   : > { %p101_p2 = scmp.eq.s32.totalorder %s626_s15, 1  ;;  %p106_p3 = scmp.ne.s32.totalorder %s815_s10, %s811_s9 }
   0x8   : > { %s997_s17 = smov (%p29_p0, %s27_s17), 0  ;;  %p107_p5 = scmp.eq.s32.totalorder %s627_s16, 1 }
   0x9   : > { %p893_p4 = por %p101_p2, %p100_p1  ;;  %s85_s20 = ssub.s32 %s827_s13, %s997_s17 }
   0xa   : > { %p630_p6 = scmp.ge.s32.totalorder %s831_s14, 1  ;;  %p88_p7 = scmp.eq.s32.totalorder %s85_s20, 0 }
   0xb   : > { %p900_p8 = por %p107_p5, %p106_p3  ;;  %p144_p9 = scmp.lt.s32.totalorder %s831_s14, 3 }
   0xc   : > { %s906_s22 = scalar_select %p88_p7, %s819_s11, %s90_s18  }
   0xd   : > { %p145_p10 = pnand %p630_p6, %p144_p9 }
   0xe   : > { %p174_p11 = scmp.lt.s32.totalorder (!%p145_p10), %s823_s12, 1  ;;  %s171_s4 = sand.u32 (!%p145_p10), 1, %s815_s10  }
   0xf   : > { %148 = sbr.rel (%p145_p10) target bundleno = 248 (0xf8), region = 28  ;;  %s631_s5 = sshll.u32 (!%p145_p10), %s171_s4, 5 }
  0x10   : > { %s173_s6 = scalar_lea.vmem (!%p145_p10), [#allocation2], %s631_s5  ;;  %s655_s8 = sshll.u32 (!%p145_p10), %s823_s12, 9 }
  0x11   : > { %s536_s7 = sshll.u32 (!%p145_p10), %s173_s6, 4  ;;  %s939_s18 = scalar_lea.hbm (!%p145_p10), %s988_s2, %s655_s8  ;;  %s934_s7 = int_to_ptr.vmem [resolvable:$true] %s536_s7 }
  0x12   : > { %s941_s20 = scalar_lea.sflag (!%p145_p10), [#allocation3], %s171_s4 }
  0x14   : > { %v833_v0 = vmov 0.0   ;;  %s175_s23 = scalar_select %p174_p11, %s823_s12, 1  ;;  %vm834_vm0 = vmmov 0   ;;  %vm199_vm1 = vcmask 15360   ;;  %vm516_vm2 = vcmask 130048  }
  0x15   : > { %668 = vmatprep.subr.mxu0 %v833_v0  ;;  %675 = vmatprep.subr.mxu1 %v833_v0  ;;  %s835_s12 = smov [#allocation2]  }
  0x16   : > { %672 = vmatprep.mubr.msk.f32.mxu0 %vm834_vm0, %v833_v0  ;;  %679 = vmatprep.mubr.msk.f32.mxu1 %vm834_vm0, %v833_v0  ;;  %s654_s24 = sshll.u32 %s175_s23, 6  ;;  %s653_s28 = sshll.u32 %s175_s23, 5 }
  0x17   : > { %s186_s27 = scalar_lea.vmem %s987_s1, %s654_s24  ;;  %s181_s3 = scalar_lea.vmem %s986_s0, %s653_s28 }
  0x18   : > { %v192_v1 = vld [vmem:[%s186_s27 + $0x8] sm:$0xff]  ;;  %v194_v2 = vld [vmem:[%s186_s27 + $0x18] sm:$0xff]  ;;  %v191_v3 = vld [vmem:[%s186_s27] sm:$0xff]  ;;  %s755_s23 = scalar_lea.vmem %s934_s7, 512  ;;  %s759_s24 = sshll.u32 %s835_s12, 4  ;;  %s760_s24 = int_to_ptr.vmem [resolvable:$false] %s759_s24 }
  0x19   : > { %669 = vmatpush3.xpose.msk.msra.mxu0 %vm199_vm1, %v192_v1  ;;  %676 = vmatpush3.xpose.msk.msra.mxu1 %vm199_vm1, %v194_v2  ;;  %v193_v4 = vld [vmem:[%s186_s27 + $0x10] sm:$0xff]  ;;  %v187_v5 = vld [vmem:[%s181_s3] sm:$0xff]  ;;  %v188_v6 = vld [vmem:[%s181_s3 + $0x8] sm:$0xff]  ;;  %p756_p12 = scmp.ne.s32.totalorder %s934_s7, %s755_s23  ;;  %s761_s25 = scalar_lea.vmem %s760_s24, 1024 }
  0x1a   : > { %670 = vmatprep.subr.mxu0 %v833_v0  ;;  %677 = vmatprep.subr.mxu1 %v833_v0  ;;  %v196_v7 = vld [vmem:[%s186_s27 + $0x28] sm:$0xff]  ;;  %v198_v8 = vld [vmem:[%s186_s27 + $0x38] sm:$0xff]  ;;  %v195_v9 = vld [vmem:[%s186_s27 + $0x20] sm:$0xff]  ;;  %p762_p1 = scmp.lt.s32.totalorder %s934_s7, %s760_s24  ;;  %p763_p2 = scmp.lt.s32.totalorder %s761_s25, %s755_s23 }
  0x1b   : > { %v197_v10 = vld [vmem:[%s186_s27 + $0x30] sm:$0xff]  ;;  %v190_v12 = vld [vmem:[%s181_s3 + $0x18] sm:$0xff]  ;;  %p757_p13 = pnand %p756_p12, %p893_p4 }
  0x1c   : > { %v189_v11 = vld [vmem:[%s181_s3 + $0x10] sm:$0xff]  ;;  %p764_p3 = por %p763_p2, %p762_p1 }
  0x1d   : > { %671 = vmatpush3.xpose.msk.msra.mxu0 %vm199_vm1, %v191_v3  ;;  %678 = vmatpush3.xpose.msk.msra.mxu1 %vm199_vm1, %v193_v4  ;;  %p758_p0 = pneg %p757_p13 }
  0x1e   : > { %682 = vmatprep.subr.mxu0 %v833_v0  ;;  %689 = vmatprep.subr.mxu1 %v833_v0 }
  0x1f   : > { %p765_p5 = pnand %p764_p3, %p758_p0 }
  0x20   : > { %673 = vmatmul.mubr.msk.f32.vlgmr.msra.gmra.mxu0 %vm199_vm1, %v187_v5  ;;  %680 = vmatmul.mubr.msk.f32.vlgmr.msra.gmra.mxu1 %vm199_vm1, %v188_v6 }
  0x21   : > { %683 = vmatpush3.xpose.msk.msra.mxu0 %vm199_vm1, %v196_v7  ;;  %690 = vmatpush3.xpose.msk.msra.mxu1 %vm199_vm1, %v198_v8 }
  0x22   : > { %684 = vmatprep.subr.mxu0 %v833_v0  ;;  %691 = vmatprep.subr.mxu1 %v833_v0 }
  0x23   : > { %686 = vmatprep.mubr.msk.f32.mxu0 %vm834_vm0, %v833_v0  ;;  %693 = vmatprep.mubr.msk.f32.mxu1 %vm834_vm0, %v833_v0 }
  0x25   : > { %685 = vmatpush3.xpose.msk.msra.mxu0 %vm199_vm1, %v195_v9  ;;  %692 = vmatpush3.xpose.msk.msra.mxu1 %vm199_vm1, %v197_v10 }
  0x28   : > { %687 = vmatmul.mubr.msk.f32.vlgmr.msra.gmra.mxu0 %vm199_vm1, %v189_v11  ;;  %694 = vmatmul.mubr.msk.f32.vlgmr.msra.gmra.mxu1 %vm199_vm1, %v190_v12 }
  0xe0   : > { %v275_v13 = vpop.f32.mrf.mxu0  ;;  %v354_v14 = vpop.f32.mrf.mxu1 }
  0xe1   : > { %517 = vst.msk [vmem:[%s173_s6] sm:$0xff] %vm516_vm2, %v275_v13  ;;  %518 = vst.msk [vmem:[%s173_s6 + $0x8] sm:$0xff] %vm516_vm2, %v354_v14 }
  0xe2   : > { %v674_v15 = vpop.f32.mrf.mxu0  ;;  %v681_v16 = vpop.f32.mrf.mxu1 }
  0xe8   : > { %v433_v17 = vpop.f32.mrf.mxu0  ;;  %v512_v18 = vpop.f32.mrf.mxu1 }
  0xe9   : > { %519 = vst.msk [vmem:[%s173_s6 + $0x10] sm:$0xff] %vm516_vm2, %v433_v17  ;;  %520 = vst.msk [vmem:[%s173_s6 + $0x18] sm:$0xff] %vm516_vm2, %v512_v18 }
  0xea   : > { %v688_v19 = vpop.f32.mrf.mxu0  ;;  %v695_v20 = vpop.f32.mrf.mxu1 }
  0xeb   : > { %768 = shalt.err (!%p765_p5)
}
  0xec   : > { %s769_s26 = scalar_lea.hbm %s939_s18, 512  ;;  %s773_s29 = scalar_lea.hbm %s988_s2, 1024 }
  0xed   : > { %p770_p6 = scmp.ne.s32.totalorder %s939_s18, %s769_s26  ;;  %p774_p10 = scmp.lt.s32.totalorder %s939_s18, %s988_s2 }
  0xee   : > { %p775_p11 = scmp.lt.s32.totalorder %s773_s29, %s769_s26 }
  0xef   : > { %p771_p7 = pnand %p770_p6, %p893_p4 }
  0xf0   : > { %p776_p12 = por %p775_p11, %p774_p10 }
  0xf1   : > { %p772_p9 = pneg %p771_p7 }
  0xf3   : > { %p777_p13 = pnand %p776_p12, %p772_p9 }
  0xf5   : > { %780 = shalt.err (!%p777_p13)
}
  0xf6   : > { %s836_s4 = smov 128   ;;  %s837_s5 = smov 8  }
  0xf7   : > { %696 = dma.vmem_to_hbm [thread:$0]  (%p893_p4), %s934_s7, 512, %s939_s18, %s941_s20, %s836_s4, %s836_s4, %s837_s5  }
  0xf8 PF: > { %p702_p0 = scmp.ge.s32.totalorder %s831_s14, 2  ;;  %s551_s6 = sand.u32 1, %s811_s9  }
  0xf9   : > { %s552_s8 = scalar_lea.sflag [#allocation3], %s551_s6 }
  0xfa   : > { %p699_p1 = pnand %p702_p0, %p900_p8 }
  0xfc   : > { %p700_p2 = pneg %p699_p1 }
  0xfe   : > { %806 = dma.done.wait (%p700_p2), %s552_s8, 512  }
  0xff   : > { %808 = vsyncadd (%p700_p2), %s552_s8, 4294966784  ;;  %s15_s14 = sadd.s32 1, %s831_s14   ;;  %s991_s9 = smov %s815_s10 }
 0x100   : > { %p12_p3 = scmp.ge.s32.totalorder %s15_s14, 4   ;;  %s992_s10 = smov %s819_s11 }
 0x101   : > { %s993_s11 = smov %s906_s22  ;;  %s994_s12 = smov %s827_s13 }
 0x102   : > { %s995_s13 = smov %s997_s17  ;;  %14 = sbr.rel (!%p12_p3) target bundleno = 4 (0x4), region = 66 }
 0x107   :  { %557 = vsyncpa [#allocation3], 1 }
 0x108   :  { %559 = vsyncpa [#allocation3 + $0x1], 1 }

</bundles_post_ra>
